<compile_context>
chip_gen: v6e
topology: v6e:2x2x1
jax: 0.10.0
libtpu: 0.0.40
codegen_flags: <defaults>
</compile_context>

<pallas_src>
import functools

import jax
import jax.numpy as jnp
from jax.experimental import pallas as pl
from jax.experimental.pallas import tpu as pltpu


def _se_fusion_kernel(x1_ref, x2_ref, w1a_ref, w1b_ref, w2a_ref, w2b_ref,
                      o1_ref, o2_ref, *, inv_hw):
    # x1_ref / x2_ref block: (TB, C, HWp)   (HWp zero-padded beyond true HW)
    x1 = x1_ref[...]
    x2 = x2_ref[...]

    # Squeeze: global average pool over the spatial (lane) dim.
    # Padded lanes are zero, so sum * (1 / true_HW) == mean over true HW.
    m1 = jnp.sum(x1, axis=-1) * inv_hw          # (TB, C)
    m2 = jnp.sum(x2, axis=-1) * inv_hw          # (TB, C)

    # Excite: fc1 -> ReLU -> fc2 -> Sigmoid, batched over TB rows.
    h = (jnp.dot(m1, w1a_ref[...], preferred_element_type=jnp.float32)
         + jnp.dot(m2, w1b_ref[...], preferred_element_type=jnp.float32))   # (TB, hidden)
    h = jnp.maximum(h, 0.0)
    s1 = jax.nn.sigmoid(jnp.dot(h, w2a_ref[...],
                                preferred_element_type=jnp.float32))        # (TB, C)
    s2 = jax.nn.sigmoid(jnp.dot(h, w2b_ref[...],
                                preferred_element_type=jnp.float32))        # (TB, C)

    # Rescale: per-(batch, channel) scale broadcast over the spatial lanes.
    o1_ref[...] = (x1 * s1[:, :, None]).astype(o1_ref.dtype)
    o2_ref[...] = (x2 * s2[:, :, None]).astype(o2_ref.dtype)


def se_fusion(x1, x2, w1, w2):
    """x1, x2: (B, C, H, W) float32.  w1: (2C//4, 2C), w2: (2C, 2C//4)
    (PyTorch nn.Linear weight layout).  Returns (out1, out2) same shapes as inputs."""
    B, C, H, W = x1.shape
    HW = H * W
    two_c = 2 * C
    hidden = w1.shape[0]
    assert w1.shape == (hidden, two_c) and w2.shape == (two_c, hidden)

    # Pre-split & pre-transpose weights once in XLA (free) so the in-kernel
    # excite needs no concat, no sublane slicing and no transposes.
    w1a = jnp.transpose(w1[:, :C])      # (C, hidden)
    w1b = jnp.transpose(w1[:, C:])      # (C, hidden)
    w2a = jnp.transpose(w2[:C, :])      # (hidden, C)
    w2b = jnp.transpose(w2[C:, :])      # (hidden, C)

    # Flatten spatial and pad the lane dim to a multiple of 128 (lane-dense stores).
    HWp = pl.cdiv(HW, 128) * 128
    x1f = x1.reshape(B, C, HW)
    x2f = x2.reshape(B, C, HW)
    if HWp != HW:
        pad = [(0, 0), (0, 0), (0, HWp - HW)]
        x1f = jnp.pad(x1f, pad)
        x2f = jnp.pad(x2f, pad)

    # Pick a batch block TB: target ~2 MiB per input block (amortizes the
    # ~0.35 us/step pipeline overhead), hard-cap ~3 MiB per array block so the
    # double-buffered footprint (4 arrays x 2 buffers) stays under ~24-30 MiB
    # (safe even on v7x's 64 MiB VMEM), and keep the grid >= 2 where possible
    # so v7x's two TensorCores both get work along the parallel batch axis.
    bytes_per_elem = C * HWp * 4
    target_block_bytes = 2 * 1024 * 1024
    max_block_bytes = 3 * 1024 * 1024
    TB = max(1, min(B, target_block_bytes // max(bytes_per_elem, 1)))
    TB = min(TB, max(1, max_block_bytes // max(bytes_per_elem, 1)))
    if B >= 2:
        TB = min(TB, max(1, pl.cdiv(B, 2)))     # ensure at least 2 grid steps

    Bp = pl.cdiv(B, TB) * TB
    if Bp != B:
        padb = [(0, Bp - B), (0, 0), (0, 0)]
        x1f = jnp.pad(x1f, padb)
        x2f = jnp.pad(x2f, padb)
    grid = (Bp // TB,)

    # Explicit scoped-VMEM budget: 4 big arrays x 2 pipeline buffers + weights.
    block_bytes = TB * bytes_per_elem
    weight_bytes = 4 * (C * hidden * 4)
    vmem_needed = 8 * block_bytes + 2 * weight_bytes + (4 << 20)
    vmem_limit = int(min(max(vmem_needed, 32 << 20), 48 << 20))

    cost = pl.CostEstimate(
        flops=int(Bp * (4 * C * hidden * 2 + 2 * C * HWp)),
        transcendentals=int(Bp * 2 * C),
        bytes_accessed=int(4 * Bp * C * HWp * 4),
    )

    out_shape = (
        jax.ShapeDtypeStruct((Bp, C, HWp), x1.dtype),
        jax.ShapeDtypeStruct((Bp, C, HWp), x2.dtype),
    )

    grid_spec = pltpu.PrefetchScalarGridSpec(
        num_scalar_prefetch=0,
        grid=grid,
        in_specs=[
            pl.BlockSpec((TB, C, HWp), lambda b: (b, 0, 0)),
            pl.BlockSpec((TB, C, HWp), lambda b: (b, 0, 0)),
            pl.BlockSpec((C, hidden), lambda b: (0, 0)),
            pl.BlockSpec((C, hidden), lambda b: (0, 0)),
            pl.BlockSpec((hidden, C), lambda b: (0, 0)),
            pl.BlockSpec((hidden, C), lambda b: (0, 0)),
        ],
        out_specs=[
            pl.BlockSpec((TB, C, HWp), lambda b: (b, 0, 0)),
            pl.BlockSpec((TB, C, HWp), lambda b: (b, 0, 0)),
        ],
    )

    o1, o2 = pl.pallas_call(
        functools.partial(_se_fusion_kernel, inv_hw=1.0 / HW),
        out_shape=out_shape,
        grid_spec=grid_spec,
        compiler_params=pltpu.CompilerParams(
            dimension_semantics=("parallel",),
            vmem_limit_bytes=vmem_limit,
        ),
        cost_estimate=cost,
    )(x1f, x2f, w1a, w1b, w2a, w2b)

    o1 = o1[:B, :, :HW].reshape(B, C, H, W)
    o2 = o2[:B, :, :HW].reshape(B, C, H, W)
    return o1, o2


def se_fusion_ref(x1, x2, w1, w2):
    """Pure-JAX reference mirroring the PyTorch forward."""
    x = jnp.concatenate([x1, x2], axis=1)                    # (B, 2C, H, W)
    b, c = x.shape[0], x.shape[1]
    y = jnp.mean(x, axis=(2, 3))                             # (B, 2C)
    y = jnp.maximum(y @ w1.T, 0.0)                           # (B, 2C//4)
    y = jax.nn.sigmoid(y @ w2.T)                             # (B, 2C)
    out = x * y[:, :, None, None]
    return out[:, : c // 2], out[:, c // 2:]


if __name__ == "__main__":
    # Small deterministic example: batch=2, in_channels=4, spatial=16x16.
    B, C_in, H, W = 2, 4, 16, 16
    two_c = 2 * C_in
    hidden = two_c // 4  # reduction = 4

    key = jax.random.PRNGKey(0)
    k1, k2, k3, k4 = jax.random.split(key, 4)
    x1 = jax.random.normal(k1, (B, C_in, H, W), dtype=jnp.float32)
    x2 = jax.random.normal(k2, (B, C_in, H, W), dtype=jnp.float32)
    # Deterministic "Linear" weights (PyTorch layout: (out_features, in_features)).
    w1 = jax.random.normal(k3, (hidden, two_c), dtype=jnp.float32) * 0.3
    w2 = jax.random.normal(k4, (two_c, hidden), dtype=jnp.float32) * 0.3

    out1, out2 = se_fusion(x1, x2, w1, w2)
    jax.block_until_ready((out1, out2))

    ref1, ref2 = se_fusion_ref(x1, x2, w1, w2)
    assert jnp.allclose(out1, ref1, atol=1e-5, rtol=1e-5)
    assert jnp.allclose(out2, ref2, atol=1e-5, rtol=1e-5)

    print("KERNEL_OK")
</pallas_src>

<mosaic_0001>
module attributes {stable_mosaic.version = 11 : i64} {
  func.func @_se_fusion_kernel(%arg0: i32, %arg1: memref<1x4x256xf32, #tpu.memory_space<vmem>>, %arg2: memref<1x4x256xf32, #tpu.memory_space<vmem>>, %arg3: memref<4x2xf32, #tpu.memory_space<vmem>>, %arg4: memref<4x2xf32, #tpu.memory_space<vmem>>, %arg5: memref<2x4xf32, #tpu.memory_space<vmem>>, %arg6: memref<2x4xf32, #tpu.memory_space<vmem>>, %arg7: memref<1x4x256xf32, #tpu.memory_space<vmem>>, %arg8: memref<1x4x256xf32, #tpu.memory_space<vmem>>) attributes {dimension_semantics = [#tpu.dimension_semantics<parallel>], iteration_bounds = array<i64: 2>, scalar_prefetch = 0 : i64, scratch_operands = 0 : i64, tpu.core_type = #tpu.core_type<tc>, window_params = [{transform_indices = @transform_0, window_bounds = array<i64: 1, 4, 256>}, {transform_indices = @transform_1, window_bounds = array<i64: 1, 4, 256>}, {pipeline_mode = #tpu.pipeline_mode<synchronous>, transform_indices = @transform_2, window_bounds = array<i64: 4, 2>}, {pipeline_mode = #tpu.pipeline_mode<synchronous>, transform_indices = @transform_3, window_bounds = array<i64: 4, 2>}, {pipeline_mode = #tpu.pipeline_mode<synchronous>, transform_indices = @transform_4, window_bounds = array<i64: 2, 4>}, {pipeline_mode = #tpu.pipeline_mode<synchronous>, transform_indices = @transform_5, window_bounds = array<i64: 2, 4>}, {transform_indices = @transform_6, window_bounds = array<i64: 1, 4, 256>}, {transform_indices = @transform_7, window_bounds = array<i64: 1, 4, 256>}]} {
    %c0 = arith.constant 0 : index
    %c0_0 = arith.constant 0 : index
    %c0_1 = arith.constant 0 : index
    %0 = vector.load %arg1[%c0, %c0_0, %c0_1] : memref<1x4x256xf32, #tpu.memory_space<vmem>>, vector<1x4x256xf32>
    %c0_2 = arith.constant 0 : index
    %c0_3 = arith.constant 0 : index
    %c0_4 = arith.constant 0 : index
    %1 = vector.load %arg2[%c0_2, %c0_3, %c0_4] : memref<1x4x256xf32, #tpu.memory_space<vmem>>, vector<1x4x256xf32>
    %cst = arith.constant dense<0.000000e+00> : vector<1x4xf32>
    %2 = vector.multi_reduction <add>, %0, %cst [2] : vector<1x4x256xf32> to vector<1x4xf32>
    %cst_5 = arith.constant 3.906250e-03 : f32
    %3 = vector.broadcast %cst_5 : f32 to vector<1x4xf32>
    %4 = arith.mulf %2, %3 : vector<1x4xf32>
    %cst_6 = arith.constant dense<0.000000e+00> : vector<1x4xf32>
    %5 = vector.multi_reduction <add>, %1, %cst_6 [2] : vector<1x4x256xf32> to vector<1x4xf32>
    %cst_7 = arith.constant 3.906250e-03 : f32
    %6 = vector.broadcast %cst_7 : f32 to vector<1x4xf32>
    %7 = arith.mulf %5, %6 : vector<1x4xf32>
    %c0_8 = arith.constant 0 : index
    %c0_9 = arith.constant 0 : index
    %8 = vector.load %arg3[%c0_8, %c0_9] : memref<4x2xf32, #tpu.memory_space<vmem>>, vector<4x2xf32>
    %cst_10 = arith.constant dense<0.000000e+00> : vector<1x2xf32>
    %9 = tpu.matmul %4, %8, %cst_10 {dimension_numbers = #tpu.dot_dimension_numbers<[1], [0], [0], [1], [0, 0, 1, 1], [], []>} : vector<1x4xf32>, vector<4x2xf32>, vector<1x2xf32> -> vector<1x2xf32>
    %c0_11 = arith.constant 0 : index
    %c0_12 = arith.constant 0 : index
    %10 = vector.load %arg4[%c0_11, %c0_12] : memref<4x2xf32, #tpu.memory_space<vmem>>, vector<4x2xf32>
    %cst_13 = arith.constant dense<0.000000e+00> : vector<1x2xf32>
    %11 = tpu.matmul %7, %10, %cst_13 {dimension_numbers = #tpu.dot_dimension_numbers<[1], [0], [0], [1], [0, 0, 1, 1], [], []>} : vector<1x4xf32>, vector<4x2xf32>, vector<1x2xf32> -> vector<1x2xf32>
    %12 = arith.addf %9, %11 : vector<1x2xf32>
    %cst_14 = arith.constant 0.000000e+00 : f32
    %13 = vector.broadcast %cst_14 : f32 to vector<1x2xf32>
    %14 = arith.maximumf %12, %13 : vector<1x2xf32>
    %c0_15 = arith.constant 0 : index
    %c0_16 = arith.constant 0 : index
    %15 = vector.load %arg5[%c0_15, %c0_16] : memref<2x4xf32, #tpu.memory_space<vmem>>, vector<2x4xf32>
    %cst_17 = arith.constant dense<0.000000e+00> : vector<1x4xf32>
    %16 = tpu.matmul %14, %15, %cst_17 {dimension_numbers = #tpu.dot_dimension_numbers<[1], [0], [0], [1], [0, 0, 1, 1], [], []>} : vector<1x2xf32>, vector<2x4xf32>, vector<1x4xf32> -> vector<1x4xf32>
    %17 = arith.negf %16 : vector<1x4xf32>
    %18 = math.exp %17 : vector<1x4xf32>
    %cst_18 = arith.constant 1.000000e+00 : f32
    %19 = vector.broadcast %cst_18 : f32 to vector<1x4xf32>
    %20 = arith.addf %19, %18 : vector<1x4xf32>
    %21 = arith.divf %19, %20 : vector<1x4xf32>
    %c0_19 = arith.constant 0 : index
    %c0_20 = arith.constant 0 : index
    %22 = vector.load %arg6[%c0_19, %c0_20] : memref<2x4xf32, #tpu.memory_space<vmem>>, vector<2x4xf32>
    %cst_21 = arith.constant dense<0.000000e+00> : vector<1x4xf32>
    %23 = tpu.matmul %14, %22, %cst_21 {dimension_numbers = #tpu.dot_dimension_numbers<[1], [0], [0], [1], [0, 0, 1, 1], [], []>} : vector<1x2xf32>, vector<2x4xf32>, vector<1x4xf32> -> vector<1x4xf32>
    %24 = arith.negf %23 : vector<1x4xf32>
    %25 = math.exp %24 : vector<1x4xf32>
    %cst_22 = arith.constant 1.000000e+00 : f32
    %26 = vector.broadcast %cst_22 : f32 to vector<1x4xf32>
    %27 = arith.addf %26, %25 : vector<1x4xf32>
    %28 = arith.divf %26, %27 : vector<1x4xf32>
    %29 = vector.shape_cast %21 : vector<1x4xf32> to vector<1x4x1xf32>
    %30 = vector.broadcast %29 : vector<1x4x1xf32> to vector<1x4x256xf32>
    %31 = arith.mulf %0, %30 : vector<1x4x256xf32>
    %c0_23 = arith.constant 0 : index
    %c0_24 = arith.constant 0 : index
    %c0_25 = arith.constant 0 : index
    %32 = vector.load %arg7[%c0_23, %c0_24, %c0_25] : memref<1x4x256xf32, #tpu.memory_space<vmem>>, vector<1x4x256xf32>
    tpu.vector_store %arg7[%c0_23, %c0_24, %c0_25], %31 {strides = array<i32>} : memref<1x4x256xf32, #tpu.memory_space<vmem>>, vector<1x4x256xf32>,
    %33 = vector.shape_cast %28 : vector<1x4xf32> to vector<1x4x1xf32>
    %34 = vector.broadcast %33 : vector<1x4x1xf32> to vector<1x4x256xf32>
    %35 = arith.mulf %1, %34 : vector<1x4x256xf32>
    %c0_26 = arith.constant 0 : index
    %c0_27 = arith.constant 0 : index
    %c0_28 = arith.constant 0 : index
    %36 = vector.load %arg8[%c0_26, %c0_27, %c0_28] : memref<1x4x256xf32, #tpu.memory_space<vmem>>, vector<1x4x256xf32>
    tpu.vector_store %arg8[%c0_26, %c0_27, %c0_28], %35 {strides = array<i32>} : memref<1x4x256xf32, #tpu.memory_space<vmem>>, vector<1x4x256xf32>,
    return
  }
  func.func @transform_0(%arg0: i32) -> (i32, i32, i32) {
    %c0_i32 = arith.constant 0 : i32
    %c0_i32_0 = arith.constant 0 : i32
    %c0_i32_1 = arith.constant 0 : i32
    return %arg0, %c0_i32, %c0_i32_0 : i32, i32, i32
  }
  func.func @transform_1(%arg0: i32) -> (i32, i32, i32) {
    %c0_i32 = arith.constant 0 : i32
    %c0_i32_0 = arith.constant 0 : i32
    %c0_i32_1 = arith.constant 0 : i32
    return %arg0, %c0_i32, %c0_i32_0 : i32, i32, i32
  }
  func.func @transform_2(%arg0: i32) -> (i32, i32) {
    %c0_i32 = arith.constant 0 : i32
    %c0_i32_0 = arith.constant 0 : i32
    %c0_i32_1 = arith.constant 0 : i32
    return %c0_i32, %c0_i32_0 : i32, i32
  }
  func.func @transform_3(%arg0: i32) -> (i32, i32) {
    %c0_i32 = arith.constant 0 : i32
    %c0_i32_0 = arith.constant 0 : i32
    %c0_i32_1 = arith.constant 0 : i32
    return %c0_i32, %c0_i32_0 : i32, i32
  }
  func.func @transform_4(%arg0: i32) -> (i32, i32) {
    %c0_i32 = arith.constant 0 : i32
    %c0_i32_0 = arith.constant 0 : i32
    %c0_i32_1 = arith.constant 0 : i32
    return %c0_i32, %c0_i32_0 : i32, i32
  }
  func.func @transform_5(%arg0: i32) -> (i32, i32) {
    %c0_i32 = arith.constant 0 : i32
    %c0_i32_0 = arith.constant 0 : i32
    %c0_i32_1 = arith.constant 0 : i32
    return %c0_i32, %c0_i32_0 : i32, i32
  }
  func.func @transform_6(%arg0: i32) -> (i32, i32, i32) {
    %c0_i32 = arith.constant 0 : i32
    %c0_i32_0 = arith.constant 0 : i32
    %c0_i32_1 = arith.constant 0 : i32
    return %arg0, %c0_i32, %c0_i32_0 : i32, i32, i32
  }
  func.func @transform_7(%arg0: i32) -> (i32, i32, i32) {
    %c0_i32 = arith.constant 0 : i32
    %c0_i32_0 = arith.constant 0 : i32
    %c0_i32_1 = arith.constant 0 : i32
    return %arg0, %c0_i32, %c0_i32_0 : i32, i32, i32
  }
}

</mosaic_0001>

<bundles_post_ra>
// kernel: tpu_custom_call.1
= control target key start
LH: loop header
LB: loop body
LE: loop exit
PB: predicated region body
PF: predicated region fallthrough
CT: control target
= control target key end

     0   :  { %s1500_s0 = inlined_call_operand.hbm [shape: f32[2,4,256], index: 0, kind: input, shape index: {}]   ;;  %s1501_s1 = inlined_call_operand.hbm [shape: f32[2,4,256], index: 1, kind: input, shape index: {}]   ;;  %s1502_s2 = inlined_call_operand.vmem [shape: f32[4,2], index: 2, kind: input, shape index: {}]   ;;  %s1503_s3 = inlined_call_operand.vmem [shape: f32[4,2], index: 3, kind: input, shape index: {}]   ;;  %s1504_s4 = inlined_call_operand.vmem [shape: f32[2,4], index: 4, kind: input, shape index: {}]   ;;  %s1505_s5 = inlined_call_operand.vmem [shape: f32[2,4], index: 5, kind: input, shape index: {}]   ;;  %s1506_s6 = inlined_call_operand.hbm [shape: f32[2,4,256], index: 6, kind: output, shape index: {0}]   ;;  %s1507_s7 = inlined_call_operand.hbm [shape: f32[2,4,256], index: 7, kind: output, shape index: {1}]  }
   0x1   :  { %1514 = sst [smem:[#allocation14_spill]] %s1500_s0 }
   0x2   :  { %13 = vsyncpa [#allocation3], 0 }
   0x3   :  { %15 = vsyncpa [#allocation3 + $0x1], 0 }
   0x4   :  { %16 = vsyncpa [#allocation6], 0 }
   0x5   :  { %18 = vsyncpa [#allocation6 + $0x1], 0 }
   0x6   :  { %19 = vsyncpa [#allocation4], 0 }
   0x7   :  { %21 = vsyncpa [#allocation4 + $0x1], 0 }
   0x8   :  { %22 = vsyncpa [#allocation9], 0 }
   0x9   :  { %24 = vsyncpa [#allocation9 + $0x1], 0  ;;  %s1227_s24 = smov 0   ;;  %s1229_s25 = smov 0  }
   0xa   :  { %s1231_s26 = smov 0   ;;  %s1233_s27 = smov 0  }
   0xb LB: > { %s1248_s28 = sadd.s32 4294967295, %s1178_s27   ;;  %s891_s29 = sadd.s32 4294967294, %s1178_s27   ;;  %s1178_s27 = sphi %s1233_s27, %s1536_s27   ;;  %s1174_s26 = sphi %s1231_s26, %s1535_s26   ;;  %s1170_s25 = sphi %s1229_s25, %s1534_s25   ;;  %s1166_s24 = sphi %s1227_s24, %s1533_s24  }
   0xc   : > { %s1252_s30 = sadd.s32 1, %s1178_s27   ;;  %s37_s8 = sadd.s32 1, %s1174_s26 }
   0xd   : > { %s34_s9 = ssub.s32 %s1178_s27, %s1252_s30  ;;  %p44_p0 = scmp.ne.s32.totalorder %s1174_s26, %s1170_s25 }
   0xe   : > { %p35_p1 = scmp.eq.s32.totalorder %s34_s9, 0  ;;  %p45_p2 = scmp.eq.s32.totalorder %s1178_s27, 0 }
   0xf   : > { %p50_p3 = scmp.ne.s32.totalorder %s1170_s25, %s1166_s24  ;;  %p51_p4 = scmp.eq.s32.totalorder %s1248_s28, 0 }
  0x10   : > { %s1264_s10 = scalar_select %p35_p1, %s1174_s26, %s37_s8  }
  0x11   : > { %p1266_p5 = por %p45_p2, %p44_p0  ;;  %p1270_p6 = por %p51_p4, %p50_p3 }
  0x12   : > { %p184_p7 = scmp.eq.s32.totalorder %s1248_s28, 1  ;;  %p190_p8 = scmp.eq.s32.totalorder %s891_s29, 1 }
  0x13   : > { %s1516_s12 = scalar_select %p1270_p6, 1, 0 }
  0x14   : > { %p977_p10 = scmp.lt.s32.totalorder %s1178_s27, 2  ;;  %p1277_p11 = por %p184_p7, %p44_p0 }
  0x15   : > { %p1281_p12 = por %p190_p8, %p50_p3  ;;  %s1286_s15 = sand.u32 1, %s1174_s26  }
  0x16   : > { %s1517_s13 = scalar_select %p1277_p11, 1, 0 }
  0x17   : > { %s1518_s14 = scalar_select %p1281_p12, 1, 0 }
  0x18   : > { %s1509_s16 = sshll.u32 %s1178_s27, 7  ;;  %s1508_s17 = sshll.u32 %s1286_s15, 3 }
  0x19   : > { %s1519_s0 = sld [smem:[#allocation14_spill]]  ;;  %s252_s21 = scalar_lea.vmem [#allocation2], %s1508_s17 }
  0x1a   : > { %s260_s22 = sshll.u32 %s252_s21, 4  ;;  %p1301_p13 = pnand %p977_p10, %p1266_p5  ;;  %s1305_s22 = int_to_ptr.vmem [resolvable:$true] %s260_s22 }
  0x1b   : > { %s249_s29 = scalar_lea.sflag [#allocation3], %s1286_s15 }
  0x1c   : > { %p1026_p3 = pneg %p1301_p13 }
  0x1f   : > { %s1295_s20 = scalar_lea.hbm %s1519_s0, %s1509_s16  ;;  %s1029_s18 = scalar_lea.hbm %s1519_s0, 256 }
  0x20   : > { %s1024_s8 = scalar_lea.hbm %s1295_s20, 128  ;;  %p1030_p5 = scmp.lt.s32.totalorder %s1295_s20, %s1519_s0 }
  0x21   : > { %p1025_p2 = scmp.ne.s32.totalorder %s1295_s20, %s1024_s8  ;;  %p1031_p8 = scmp.lt.s32.totalorder %s1029_s18, %s1024_s8 }
  0x23   : > { %p1027_p4 = pnand %p1026_p3, %p1025_p2  ;;  %p1032_p10 = por %p1031_p8, %p1030_p5 }
  0x25   : > { %p1028_p7 = pneg %p1027_p4 }
  0x27   : > { %p1033_p9 = pnand %p1032_p10, %p1028_p7 }
  0x29   : > { %1036 = shalt.err (!%p1033_p9)
}
  0x2a   : > { %s1037_s17 = scalar_lea.vmem %s1305_s22, 128  ;;  %s1180_s9 = smov [#allocation2]  }
  0x2b   : > { %p1038_p0 = scmp.ne.s32.totalorder %s1305_s22, %s1037_s17  ;;  %s1042_s11 = sshll.u32 %s1180_s9, 4  ;;  %s1043_s11 = int_to_ptr.vmem [resolvable:$false] %s1042_s11 }
  0x2c   : > { %s1044_s16 = scalar_lea.vmem %s1043_s11, 256  ;;  %p1045_p1 = scmp.lt.s32.totalorder %s1305_s22, %s1043_s11 }
  0x2d   : > { %p1040_p2 = pnand %p1038_p0, %p1026_p3  ;;  %p1046_p12 = scmp.lt.s32.totalorder %s1044_s16, %s1037_s17 }
  0x2f   : > { %p1041_p4 = pneg %p1040_p2  ;;  %p1047_p11 = por %p1046_p12, %p1045_p1 }
  0x31   : > { %p1048_p5 = pnand %p1047_p11, %p1041_p4 }
  0x33   : > { %1051 = shalt.err (!%p1048_p5)
}
  0x34   : > { %966 = dma.hbm_to_vmem [thread:$0]  (!%p1301_p13), %s1295_s20, 128, %s1305_s22, %s249_s29  }
  0x35   : > { %p1521_p9 = scmp.lt.s32.totalorder %s1178_s27, 3  ;;  %p1522_p0 = scmp.ge.s32.totalorder %s1178_s27, 1 }
  0x36   : > { %s1524_s16 = sshll.u32 %s1178_s27, 7  ;;  %s1525_s21 = sshll.u32 %s1286_s15, 3 }
  0x37   : > { %p1338_p7 = pnand %p1522_p0, %p1521_p9  ;;  %s1347_s19 = scalar_lea.hbm %s1501_s1, %s1524_s16 }
  0x38   : > { %s271_s9 = scalar_lea.vmem [#allocation5], %s1525_s21  ;;  %s268_s20 = scalar_lea.sflag [#allocation6], %s1286_s15 }
  0x39   : > { %s1523_s8 = scalar_select %p1338_p7, 1, 0 }
  0x3a   : > { %s279_s11 = sshll.u32 %s271_s9, 4  ;;  %s1052_s22 = scalar_lea.hbm %s1347_s19, 128  ;;  %s280_s11 = int_to_ptr.vmem [resolvable:$true] %s279_s11 }
  0x3b   : > { %p1053_p11 = scmp.ne.s32.totalorder %s1347_s19, %s1052_s22  ;;  %s1057_s17 = scalar_lea.hbm %s1501_s1, 256 }
  0x3c   : > { %p1058_p8 = scmp.lt.s32.totalorder %s1347_s19, %s1501_s1  ;;  %p1059_p10 = scmp.lt.s32.totalorder %s1057_s17, %s1052_s22 }
  0x3d   : > { %p1055_p12 = pnand %p1053_p11, %p1026_p3 }
  0x3e   : > { %p1060_p2 = por %p1059_p10, %p1058_p8 }
  0x3f   : > { %p1056_p1 = pneg %p1055_p12 }
  0x41   : > { %p1061_p4 = pnand %p1060_p2, %p1056_p1 }
  0x43   : > { %1064 = shalt.err (!%p1061_p4)
}
  0x44   : > { %s1065_s21 = scalar_lea.vmem %s280_s11, 128  ;;  %s1181_s15 = smov [#allocation5]  }
  0x45   : > { %p1066_p5 = scmp.ne.s32.totalorder %s280_s11, %s1065_s21  ;;  %s1070_s9 = sshll.u32 %s1181_s15, 4  ;;  %s1071_s9 = int_to_ptr.vmem [resolvable:$false] %s1070_s9 }
  0x46   : > { %s1072_s0 = scalar_lea.vmem %s1071_s9, 256  ;;  %p1073_p11 = scmp.lt.s32.totalorder %s280_s11, %s1071_s9 }
  0x47   : > { %p1068_p9 = pnand %p1066_p5, %p1026_p3  ;;  %p1074_p12 = scmp.lt.s32.totalorder %s1072_s0, %s1065_s21 }
  0x49   : > { %p1069_p0 = pneg %p1068_p9  ;;  %p1075_p6 = por %p1074_p12, %p1073_p11 }
  0x4b   : > { %p1076_p7 = pnand %p1075_p6, %p1069_p0 }
  0x4d   : > { %1079 = shalt.err (!%p1076_p7)
}
  0x4e   : > { %969 = dma.hbm_to_vmem [thread:$0]  (!%p1301_p13), %s1347_s19, 128, %s280_s11, %s268_s20  }
  0x4f   : > { %p1526_p1 = scmp.ne.s32.totalorder %s1523_s8, 0 }
  0x50   : > { %s1373_s22 = sand.u32 (!%p1526_p1), 1, %s1170_s25   ;;  %p1527_p6 = scmp.ne.s32.totalorder (!%p1526_p1), %s1516_s12, 0 }
  0x51   : > { %288 = sbr.rel (%p1526_p1) target bundleno = 820 (0x334), region = 44  ;;  %s1376_s29 = sshll.u32 (!%p1526_p1), %s1373_s22, 3 }
  0x52   : > { %s291_s17 = scalar_lea.sflag (!%p1526_p1), [#allocation3], %s1373_s22  ;;  %s294_s16 = scalar_lea.vmem (!%p1526_p1), [#allocation2], %s1376_s29 }
  0x56   : > { %1149 = dma.done.wait (%p1527_p6), %s291_s17, 128  }
  0x57   : > { %1151 = vsyncadd (%p1527_p6), %s291_s17, 4294967168  ;;  %s300_s23 = scalar_lea.sflag [#allocation6], %s1373_s22  ;;  %s303_s8 = scalar_lea.vmem [#allocation5], %s1376_s29 }
  0x58   : > { %1153 = dma.done.wait (%p1527_p6), %s300_s23, 128  }
  0x59   : > { %1155 = vsyncadd (%p1527_p6), %s300_s23, 4294967168  ;;  %vm349_vm0 = vcmask 1043456   ;;  %v1390_v0 = vld [vmem:[%s294_s16] sm:$0xff]  ;;  %v1392_v1 = vld [vmem:[%s303_s8] sm:$0xff]  ;;  %v1182_v10 = vmov 0.0   ;;  %vm1183_vm1 = vmmov 0   ;;  %v368_v13 = vlaneseq }
  0x5a   : > { %v347_v2 = vcombine.high %v1390_v0, %v1390_v0  ;;  %v350_v3 = vsel %vm349_vm0, %v1390_v0, 0.0  ;;  %v357_v4 = vcombine.high %v1392_v1, %v1392_v1  ;;  %v359_v6 = vsel %vm349_vm0, %v1392_v1, 0.0  ;;  %940 = vmatprep.subr.mxu1 %v1182_v10  ;;  %v365_v11 = vld [vmem:[%s1502_s2] sm:$0xf]  ;;  %935 = vmatprep.subr.mxu0 %v1182_v10  ;;  %s1513_s0 = sshll.u32 %s1248_s28, 7  ;;  %s336_s17 = scalar_lea.vmem [#allocation7], %s1376_s29 }
  0x5b   : > { %941 = vmatpush3.msk.msra.mxu1 %vm349_vm0, %v365_v11  ;;  %942 = vmatprep.mubr.msk.f32.mxu1 %vm1183_vm1, %v1182_v10  ;;  %v366_v12 = vld [vmem:[%s1503_s3] sm:$0xf]  ;;  %v369_v14 = vand.u32 127, %v368_v13  ;;  %v371_v15 = vshrl.u32 %v368_v13, 7  ;;  %vm374_vm2 = vcmask 31744   ;;  %vm536_vm3 = vcmask 1041408   ;;  %s1430_s12 = scalar_lea.hbm %s1506_s6, %s1513_s0 }
  0x5c   : > { %v351_v5 = vsel %vm349_vm0, %v347_v2, 0.0  ;;  %v360_v7 = vsel %vm349_vm0, %v357_v4, 0.0  ;;  %937 = vmatprep.mubr.msk.f32.mxu0 %vm1183_vm1, %v1182_v10  ;;  %950 = vmatprep.subr.mxu1 %v1182_v10  ;;  %v531_v23 = vld [vmem:[%s1504_s4] sm:$0x3]  ;;  %vm532_vm4 = vcmask 15360   ;;  %s752_s16 = sshll.u32 %s336_s17, 4  ;;  %s1432_s16 = int_to_ptr.vmem [resolvable:$true] %s752_s16 }
  0x5d   : > { %v352_v8 = vadd.f32 %v351_v5, %v350_v3  ;;  %v361_v9 = vadd.f32 %v360_v7, %v359_v6  ;;  %936 = vmatpush3.msk.msra.mxu0 %vm349_vm0, %v366_v12  ;;  %v372_v16 = vsub.s32 %v369_v14, %v371_v15  ;;  %v616_v24 = vld [vmem:[%s1505_s5] sm:$0x3]  ;;  %v698_v41 = vsub.s32 0, %v371_v15  ;;  %s1512_s19 = scalar_lea.vmem [#allocation8], %s1376_s29  ;;  %s733_s20 = scalar_lea.sflag [#allocation4], %s1373_s22 }
  0x5e   : > { %945 = vmatprep.subr.mxu0 %v1182_v10  ;;  %v1184_v46 = vmov 839922192   ;;  %s1437_s11 = sshll.u32 %s1512_s19, 4  ;;  %s1080_s18 = scalar_lea.vmem %s1432_s16, 128  ;;  %s767_s11 = int_to_ptr.vmem [resolvable:$true] %s1437_s11 }
  0x5f   : > { %353 = vadd.xlane.f32.xlu0 %v352_v8  ;;  %v705_v47 = vunpack.c.l.s4 %v1184_v46  ;;  %p1081_p13 = scmp.ne.s32.totalorder %s1432_s16, %s1080_s18  ;;  %p1528_p3 = scmp.ne.s32.totalorder %s1517_s13, 0 }
  0x60   : > { %s1185_s21 = smov [#allocation7]  }
  0x61   : > { %v706_v48 = vunpack.c.0.s8 %v705_v47  ;;  %p1082_p7 = pnand %p1081_p13, %p1528_p3  ;;  %s1084_s15 = sshll.u32 %s1185_s21, 4  ;;  %s1085_s15 = int_to_ptr.vmem [resolvable:$false] %s1084_s15 }
  0x62   : > { %s1086_s9 = scalar_lea.vmem %s1085_s15, 256  ;;  %p1087_p10 = scmp.lt.s32.totalorder %s1432_s16, %s1085_s15 }
  0x63   : > { %362 = vadd.xlane.f32.xlu0 %v361_v9  ;;  %v709_v49 = vsub.s32 %v706_v48, %v371_v15  ;;  %p1083_p8 = pneg %p1082_p7  ;;  %p1088_p2 = scmp.lt.s32.totalorder %s1086_s9, %s1080_s18 }
  0x65   : > { %p1089_p4 = por %p1088_p2, %p1087_p10 }
  0x67   : > { %p1090_p5 = pnand %p1089_p4, %p1083_p8 }
  0xe8   : > { %v354_v17 = vpop.xlane.xlu0 %353 }
  0xe9   : > { %v355_v18 = vmul.f32 0.00390625, %v354_v17 }
  0xeb   : > { %v454_v19 = vrot.slane %v355_v18, %v372_v16 }
  0xec   : > { %v363_v20 = vpop.xlane.xlu0 %362 }
  0xed   : > { %v364_v21 = vmul.f32 0.00390625, %v363_v20  ;;  %943 = vmatmul.mubr.msk.f32.vlgmr.msra.gmra.mxu1 %vm374_vm2, %v454_v19 }
  0xee   : > { %952 = vmatprep.mubr.msk.f32.mxu1 %vm1183_vm1, %v1182_v10  ;;  %951 = vmatpush3.msk.msra.mxu1 %vm536_vm3, %v616_v24 }
  0xef   : > { %v373_v22 = vrot.slane %v364_v21, %v372_v16 }
  0xf1   : > { %938 = vmatmul.mubr.msk.f32.vlgmr.msra.gmra.mxu0 %vm374_vm2, %v373_v22 }
  0xf2   : > { %947 = vmatprep.mubr.msk.f32.mxu0 %vm1183_vm1, %v1182_v10  ;;  %946 = vmatpush3.msk.msra.mxu0 %vm536_vm3, %v531_v23 }
 0x1ad   : > { %v526_v25 = vpop.f32.mrf.mxu1 }
 0x1af   : > { %v944_v26 = vpop.f32.mrf.mxu1 }
 0x1b1   : > { %v446_v27 = vpop.f32.mrf.mxu0 }
 0x1b2   : > { %v527_v28 = vadd.f32 %v526_v25, %v446_v27 }
 0x1b3   : > { %v939_v29 = vpop.f32.mrf.mxu0 }
 0x1b4   : > { %v530_v30 = vmax.f32 %v527_v28, 0.0 }
 0x1b6   : > { %948 = vmatmul.mubr.msk.f32.vlgmr.msra.gmra.mxu0 %vm532_vm4, %v530_v30  ;;  %953 = vmatmul.mubr.msk.f32.vlgmr.msra.gmra.mxu1 %vm532_vm4, %v530_v30 }
 0x276   : > { %v606_v31 = vpop.f32.mrf.mxu0  ;;  %v686_v32 = vpop.f32.mrf.mxu1 }
 0x277   : > { %v911_v33 = vmul.f32 -1.442695, %v606_v31  ;;  %v914_v34 = vmul.f32 -1.442695, %v686_v32 }
 0x278   : > { %v949_v35 = vpop.f32.mrf.mxu0  ;;  %v954_v36 = vpop.f32.mrf.mxu1 }
 0x279   : > { %1016 = vpow2.f32 %v911_v33 }
 0x27a   : > { %1018 = vpow2.f32 %v914_v34 }
 0x286   : > { %v1017_v37 = vpop.eup %1016 }
 0x287   : > { %v1019_v38 = vpop.eup %1018  ;;  %v613_v39 = vadd.f32 1.0, %v1017_v37 }
 0x288   : > { %v693_v40 = vadd.f32 1.0, %v1019_v38 }
 0x289   : > { %1020 = vrcp.f32 %v613_v39 }
 0x28a   : > { %1022 = vrcp.f32 %v693_v40 }
 0x296   : > { %v1021_v42 = vpop.eup %1020 }
 0x297   : > { %v699_v43 = vrot.slane %v1021_v42, %v698_v41  ;;  %v1023_v44 = vpop.eup %1022 }
 0x298   : > { %v717_v45 = vrot.slane %v1023_v44, %v698_v41 }
 0x299   : > { %701 = vbcast.lane.b32.xlu1 %v699_v43, 256 }
 0x29d   : > { %719 = vbcast.lane.b32.xlu1 %v717_v45, 256 }
 0x30b   : > { %v702_v50 = vpop.permute.xlu1 %701 }
 0x30c   : > { %v710_v51 = vrot.slane %v702_v50, %v709_v49 }
 0x30e   : > { %v712_v52 = vmul.f32 %v710_v51, %v1390_v0 }
 0x30f   : > { %v720_v53 = vpop.permute.xlu1 %719 }
 0x310   : > { %v728_v54 = vrot.slane %v720_v53, %v709_v49  ;;  %713 = vst [vmem:[%s336_s17] sm:$0xff] %v712_v52 }
 0x311   : > { %1093 = shalt.err (!%p1090_p5)
}
 0x312   : > { %s1094_s17 = scalar_lea.hbm %s1430_s12, 128  ;;  %s1098_s21 = scalar_lea.hbm %s1506_s6, 256 }
 0x313   : > { %p1095_p9 = scmp.ne.s32.totalorder %s1430_s12, %s1094_s17  ;;  %p1099_p12 = scmp.lt.s32.totalorder %s1430_s12, %s1506_s6 }
 0x314   : > { %p1100_p1 = scmp.lt.s32.totalorder %s1098_s21, %s1094_s17 }
 0x315   : > { %p1096_p0 = pnand %p1095_p9, %p1528_p3 }
 0x316   : > { %p1101_p6 = por %p1100_p1, %p1099_p12 }
 0x317   : > { %p1097_p11 = pneg %p1096_p0 }
 0x319   : > { %p1102_p13 = pnand %p1101_p6, %p1097_p11 }
 0x31b   : > { %1105 = shalt.err (!%p1102_p13)
}
 0x31c   : > { %959 = dma.vmem_to_hbm [thread:$0]  (%p1528_p3), %s1432_s16, 128, %s1430_s12, %s733_s20   ;;  %v730_v55 = vmul.f32 %v728_v54, %v1392_v1 }
 0x31d   : > { %s1529_s18 = sshll.u32 %s1248_s28, 7  ;;  %s1530_s9 = scalar_lea.vmem [#allocation8], %s1376_s29 }
 0x31e   : > { %s764_s19 = scalar_lea.hbm %s1507_s7, %s1529_s18  ;;  %731 = vst [vmem:[%s1530_s9] sm:$0xff] %v730_v55  ;;  %s738_s17 = scalar_lea.sflag [#allocation9], %s1373_s22 }
 0x31f   : > { %s1106_s23 = scalar_lea.vmem %s767_s11, 128  ;;  %s1186_s8 = smov [#allocation8]  }
 0x320   : > { %p1107_p7 = scmp.ne.s32.totalorder %s767_s11, %s1106_s23  ;;  %s1110_s21 = sshll.u32 %s1186_s8, 4  ;;  %s1111_s21 = int_to_ptr.vmem [resolvable:$false] %s1110_s21 }
 0x321   : > { %s1112_s16 = scalar_lea.vmem %s1111_s21, 256  ;;  %p1113_p2 = scmp.lt.s32.totalorder %s767_s11, %s1111_s21 }
 0x322   : > { %p1108_p8 = pnand %p1107_p7, %p1528_p3  ;;  %p1114_p4 = scmp.lt.s32.totalorder %s1112_s16, %s1106_s23 }
 0x324   : > { %p1109_p10 = pneg %p1108_p8  ;;  %p1115_p5 = por %p1114_p4, %p1113_p2 }
 0x326   : > { %p1116_p9 = pnand %p1115_p5, %p1109_p10 }
 0x328   : > { %1119 = shalt.err (!%p1116_p9)
}
 0x329   : > { %s1120_s28 = scalar_lea.hbm %s764_s19, 128  ;;  %s1124_s12 = scalar_lea.hbm %s1507_s7, 256 }
 0x32a   : > { %p1121_p0 = scmp.ne.s32.totalorder %s764_s19, %s1120_s28  ;;  %p1125_p1 = scmp.lt.s32.totalorder %s764_s19, %s1507_s7 }
 0x32b   : > { %p1126_p6 = scmp.lt.s32.totalorder %s1124_s12, %s1120_s28 }
 0x32c   : > { %p1122_p11 = pnand %p1121_p0, %p1528_p3 }
 0x32d   : > { %p1127_p13 = por %p1126_p6, %p1125_p1 }
 0x32e   : > { %p1123_p12 = pneg %p1122_p11 }
 0x330   : > { %p1128_p7 = pnand %p1127_p13, %p1123_p12 }
 0x332   : > { %1131 = shalt.err (!%p1128_p7)
}
 0x333   : > { %960 = dma.vmem_to_hbm [thread:$0]  (%p1528_p3), %s767_s11, 128, %s764_s19, %s738_s17  }
 0x334 PF: > { %s778_s15 = sand.u32 1, %s1166_s24   ;;  %p1531_p8 = scmp.ne.s32.totalorder %s1518_s14, 0 }
 0x335   : > { %p1532_p10 = scmp.ge.s32.totalorder %s1178_s27, 2  ;;  %s779_s0 = scalar_lea.sflag [#allocation4], %s778_s15 }
 0x337   : > { %p971_p2 = pnand %p1532_p10, %p1531_p8 }
 0x339   : > { %p972_p4 = pneg %p971_p2 }
 0x33b   : > { %1157 = dma.done.wait (%p972_p4), %s779_s0, 128  }
 0x33c   : > { %1159 = vsyncadd (%p972_p4), %s779_s0, 4294967168  ;;  %s788_s9 = scalar_lea.sflag [#allocation9], %s778_s15 }
 0x33d   : > { %1161 = dma.done.wait (%p972_p4), %s788_s9, 128  }
 0x33e   : > { %1163 = vsyncadd (%p972_p4), %s788_s9, 4294967168  ;;  %p27_p3 = scmp.ge.s32.totalorder %s1252_s30, 4   ;;  %s1533_s24 = smov %s1170_s25 }
 0x33f   : > { %s1534_s25 = smov %s1174_s26  ;;  %s1535_s26 = smov %s1264_s10 }
 0x340   : > { %s1536_s27 = smov %s1252_s30  ;;  %29 = sbr.rel (!%p27_p3) target bundleno = 11 (0xb), region = 119 }
 0x345   :  { %793 = vsyncpa [#allocation3], 1 }
 0x346   :  { %795 = vsyncpa [#allocation3 + $0x1], 1 }
 0x347   :  { %796 = vsyncpa [#allocation6], 1 }
 0x348   :  { %798 = vsyncpa [#allocation6 + $0x1], 1 }
 0x349   :  { %799 = vsyncpa [#allocation4], 1 }
 0x34a   :  { %801 = vsyncpa [#allocation4 + $0x1], 1 }
 0x34b   :  { %802 = vsyncpa [#allocation9], 1 }
 0x34c   :  { %804 = vsyncpa [#allocation9 + $0x1], 1 }

</bundles_post_ra>
